<compile_context>
chip_gen: v6e
topology: v6e:2x2x1
jax: 0.10.0
libtpu: 0.0.40
codegen_flags: <defaults>
</compile_context>

<pallas_src>
import jax
import jax.numpy as jnp
from jax.experimental import pallas as pl
from jax.experimental.pallas import tpu as pltpu


# ~2 MiB per tile: big enough to amortize the ~0.35 us/step pipeline overhead (85%+ of
# HBM roofline), small enough that double-buffered in+out (~8 MiB) fits all generations.
_TARGET_TILE_BYTES = 2 * 1024 * 1024
# Arrays at or below this size are copied as one full-array VMEM block.
_SINGLE_BLOCK_MAX_BYTES = 4 * 1024 * 1024


def _copy_kernel(x_ref, o_ref):
    # Hot path: whole-tile copy through VMEM (identity).
    o_ref[...] = x_ref[...]


def _pallas_copy_2d(x2d, tm):
    rows, cols = x2d.shape
    nbytes = int(x2d.size) * x2d.dtype.itemsize
    return pl.pallas_call(
        _copy_kernel,
        out_shape=jax.ShapeDtypeStruct((rows, cols), x2d.dtype),
        grid_spec=pltpu.PrefetchScalarGridSpec(
            num_scalar_prefetch=0,
            grid=(pl.cdiv(rows, tm),),
            in_specs=[pl.BlockSpec((tm, cols), lambda i: (i, 0))],
            out_specs=pl.BlockSpec((tm, cols), lambda i: (i, 0)),
        ),
        # Pure identity: let XLA reuse the input buffer for the output when possible.
        input_output_aliases={0: 0},
        compiler_params=pltpu.CompilerParams(dimension_semantics=("parallel",)),
        cost_estimate=pl.CostEstimate(
            flops=0, transcendentals=0, bytes_accessed=2 * nbytes
        ),
    )(x2d)


def _pick_tile_rows(rows, cols, itemsize):
    tm = _TARGET_TILE_BYTES // (cols * itemsize)
    tm = max(32, (tm // 32) * 32)  # multiple of 32 sublanes: full store width for f32/bf16/int8
    return min(tm, rows)


def const_model_forward(x):
    """Pallas implementation of ConstModel.forward: returns the input unchanged."""
    if x.size == 0:
        return x

    orig_shape = x.shape
    total = int(x.size)
    itemsize = jnp.dtype(x.dtype).itemsize
    nbytes = total * itemsize

    # Widest lane-dense column count (multiple of 128) that divides the flat length:
    # wide unmasked stores, no padding needed.
    cols = next((c for c in (2048, 1024, 512, 256, 128) if total % c == 0), 0)

    if cols == 0:
        if nbytes <= _SINGLE_BLOCK_MAX_BYTES:
            # Ragged but small: one full-array block (full dims are exempt from (8,128)).
            return _pallas_copy_2d(x.reshape(1, total), tm=1).reshape(orig_shape)
        # Ragged AND large (rare): only this path pays for a pad + trailing slice.
        pad = (-total) % 128
        x2d = jnp.pad(x.reshape(-1), (0, pad)).reshape((total + pad) // 128, 128)
        tm = _pick_tile_rows(x2d.shape[0], 128, itemsize)
        y2d = _pallas_copy_2d(x2d, tm)
        return y2d.reshape(-1)[:total].reshape(orig_shape)

    rows = total // cols
    x2d = x.reshape(rows, cols)
    if nbytes <= _SINGLE_BLOCK_MAX_BYTES:
        # Whole array fits comfortably in one VMEM block: single-step copy, no pad/slice.
        return _pallas_copy_2d(x2d, tm=rows).reshape(orig_shape)

    # Large input: lane-dense tiles of ~2 MiB, grid sharded across cores ("parallel").
    tm = _pick_tile_rows(rows, cols, itemsize)
    return _pallas_copy_2d(x2d, tm).reshape(orig_shape)


if __name__ == "__main__":
    key = jax.random.PRNGKey(0)
    k1, k2, k3 = jax.random.split(key, 3)

    # Small NCHW-style input consistent with a generic forward(input) signature.
    x_small = jax.random.normal(k1, (2, 4, 16, 16), dtype=jnp.float32)
    y_small = jax.block_until_ready(const_model_forward(x_small))
    assert y_small.shape == x_small.shape and y_small.dtype == x_small.dtype
    assert bool(jnp.all(y_small == x_small))

    # Larger input to exercise the multi-step tiled lane-dense path (8 MiB -> grid of 4).
    x_big = jax.random.normal(k2, (16, 32, 64, 64), dtype=jnp.float32)
    y_big = jax.block_until_ready(const_model_forward(x_big))
    assert y_big.shape == x_big.shape and y_big.dtype == x_big.dtype
    assert bool(jnp.all(y_big == x_big))

    # Ragged flat length (not a multiple of 128) exercises the full-array-block path.
    x_ragged = jax.random.normal(k3, (3, 5, 7), dtype=jnp.float32)
    y_ragged = jax.block_until_ready(const_model_forward(x_ragged))
    assert y_ragged.shape == x_ragged.shape and bool(jnp.all(y_ragged == x_ragged))

    print("KERNEL_OK")
</pallas_src>

<mosaic_0001>
module attributes {stable_mosaic.version = 11 : i64} {
  func.func @_copy_kernel(%arg0: i32, %arg1: memref<1x2048xf32, #tpu.memory_space<vmem>>, %arg2: memref<1x2048xf32, #tpu.memory_space<vmem>>) attributes {dimension_semantics = [#tpu.dimension_semantics<parallel>], iteration_bounds = array<i64: 1>, scalar_prefetch = 0 : i64, scratch_operands = 0 : i64, tpu.core_type = #tpu.core_type<tc>, window_params = [{transform_indices = @transform_0, window_bounds = array<i64: 1, 2048>}, {transform_indices = @transform_1, window_bounds = array<i64: 1, 2048>}]} {
    %c0 = arith.constant 0 : index
    %c0_0 = arith.constant 0 : index
    %0 = vector.load %arg1[%c0, %c0_0] : memref<1x2048xf32, #tpu.memory_space<vmem>>, vector<1x2048xf32>
    %c0_1 = arith.constant 0 : index
    %c0_2 = arith.constant 0 : index
    %1 = vector.load %arg2[%c0_1, %c0_2] : memref<1x2048xf32, #tpu.memory_space<vmem>>, vector<1x2048xf32>
    tpu.vector_store %arg2[%c0_1, %c0_2], %0 {strides = array<i32>} : memref<1x2048xf32, #tpu.memory_space<vmem>>, vector<1x2048xf32>,
    return
  }
  func.func @transform_0(%arg0: i32) -> (i32, i32) {
    %c0_i32 = arith.constant 0 : i32
    %c0_i32_0 = arith.constant 0 : i32
    return %arg0, %c0_i32 : i32, i32
  }
  func.func @transform_1(%arg0: i32) -> (i32, i32) {
    %c0_i32 = arith.constant 0 : i32
    %c0_i32_0 = arith.constant 0 : i32
    return %arg0, %c0_i32 : i32, i32
  }
}

</mosaic_0001>

<bundles_post_ra>
// kernel: tpu_custom_call.1
= control target key start
LH: loop header
LB: loop body
LE: loop exit
PB: predicated region body
PF: predicated region fallthrough
CT: control target
= control target key end

     0   :  { %6 = vsyncpa [#allocation3], 0  ;;  %s104_s0 = inlined_call_operand.hbm [shape: f32[1,2048], index: 0, kind: input, shape index: {}, may-alias: {0,1}]   ;;  %s105_s1 = inlined_call_operand.hbm [shape: f32[1,2048], index: 1, kind: output, shape index: {}, may-alias: {0,1}]  }
   0x1   :  { %7 = vsyncpa [#allocation4], 0  ;;  %s86_s6 = smov [#allocation2]  }
   0x2   :  { %s14_s7 = sshll.u32 %s86_s6, 4  ;;  %s15_s7 = int_to_ptr.vmem [resolvable:$true] %s14_s7 }
   0x3   :  { %s50_s8 = scalar_lea.vmem %s15_s7, 256  ;;  %p55_p1 = scmp.lt.s32.totalorder %s15_s7, %s15_s7 }
   0x4   :  { %p51_p0 = scmp.ne.s32.totalorder %s15_s7, %s50_s8  ;;  %p56_p2 = scmp.lt.s32.totalorder %s50_s8, %s50_s8 }
   0x6   :  { %p57_p3 = por %p56_p2, %p55_p1 }
   0x8   :  { %p58_p4 = pnand %p57_p3, %p51_p0 }
   0xa   :  { %61 = shalt.err (!%p58_p4)
}
   0xb   :  { %17 = dma.hbm_to_vmem [thread:$0]  %s104_s0, 256, %s15_s7, [#allocation3]  }
   0xc   :  { %82 = dma.done.wait [#allocation3], 256  }
   0xd   :  { %83 = vsyncadd [#allocation3], 4294967040  ;;  %s87_s11 = smov [#allocation5]   ;;  %v21_v0 = vld [vmem:[#allocation2] sm:$0xff]  ;;  %v22_v1 = vld [vmem:[#allocation2 + $0x8] sm:$0xff] }
   0xe   :  { %s31_s12 = sshll.u32 %s87_s11, 4  ;;  %23 = vst [vmem:[#allocation5] sm:$0xff] %v21_v0  ;;  %24 = vst [vmem:[#allocation5 + $0x8] sm:$0xff] %v22_v1  ;;  %s32_s12 = int_to_ptr.vmem [resolvable:$true] %s31_s12 }
   0xf   :  { %s62_s13 = scalar_lea.vmem %s32_s12, 256  ;;  %p67_p6 = scmp.lt.s32.totalorder %s32_s12, %s32_s12 }
  0x10   :  { %p63_p5 = scmp.ne.s32.totalorder %s32_s12, %s62_s13  ;;  %p68_p7 = scmp.lt.s32.totalorder %s62_s13, %s62_s13 }
  0x12   :  { %p69_p8 = por %p68_p7, %p67_p6 }
  0x14   :  { %p70_p9 = pnand %p69_p8, %p63_p5 }
  0x16   :  { %73 = shalt.err (!%p70_p9)
}
  0x17   :  { %34 = dma.vmem_to_hbm [thread:$0]  %s32_s12, 256, %s105_s1, [#allocation4]  }
  0x18   :  { %84 = dma.done.wait [#allocation4], 256  }
  0x19   :  { %85 = vsyncadd [#allocation4], 4294967040 }
  0x1a   :  { %38 = vsyncpa [#allocation3], 1 }
  0x1b   :  { %39 = vsyncpa [#allocation4], 1 }

</bundles_post_ra>
